<compile_context>
chip_gen: v7x
topology: tpu7x:2x2x1
jax: 0.10.0
libtpu: 0.0.40
codegen_flags: <defaults>
</compile_context>

<pallas_src>
import jax
import jax.numpy as jnp
from jax.experimental import pallas as pl
from jax.experimental.pallas import tpu as pltpu


def _upsample2x_kernel(x_ref, e_ref, o_ref):
    """One grid step: (tr, W) input rows -> (tr, 2, 2W) output block.

    x_ref: (tr, W)  float32   -- tr rows of the flattened (B*C*H, W) input
    e_ref: (W, 2W)  bfloat16  -- one-hot column-duplication matrix E[w, 2w+dw] = 1
    o_ref: (tr, 2, 2W) float32 -- out[r, dh, 2w+dw] = x[r, w]
    """
    x = x_ref[...]                                   # (tr, W) f32
    e = e_ref[...]                                   # (W, 2W) bf16

    # Exact 3-way split of f32 into bf16-representable pieces:
    #   p1 = top 8 significant bits, p2 = next 8, p3 = last 8;  p1+p2+p3 == x exactly.
    mask = jnp.uint32(0xFFFF0000)
    xb = pltpu.bitcast(x, jnp.uint32)
    p1 = pltpu.bitcast(xb & mask, jnp.float32)
    r1 = x - p1                                      # exact
    p2 = pltpu.bitcast(pltpu.bitcast(r1, jnp.uint32) & mask, jnp.float32)
    p3 = r1 - p2                                     # exact, <= 8 significant bits

    # Lane duplication via one-hot matmuls on the MXU (bf16 in, f32 accumulate).
    # Each product is piece*1.0 or piece*0.0, so every pass is exact; the f32
    # re-summation reconstructs x exactly, permuted to the interleaved columns.
    y = jnp.dot(p1.astype(jnp.bfloat16), e, preferred_element_type=jnp.float32)
    y = y + jnp.dot(p2.astype(jnp.bfloat16), e, preferred_element_type=jnp.float32)
    y = y + jnp.dot(p3.astype(jnp.bfloat16), e, preferred_element_type=jnp.float32)
    y = y.astype(o_ref.dtype)                        # (tr, 2W)

    # Row duplication: the size-2 output axis takes the two copies directly.
    o_ref[:, 0, :] = y
    o_ref[:, 1, :] = y


def _round_up(n, m):
    return ((n + m - 1) // m) * m


def _pick_block_rows(R, W, budget_bytes=8 * 1024 * 1024):
    """Rows of the flattened (B*C*H, W) input handled per grid step.

    The (tr, 2, 2W) output block is tiled in VMEM as (tr, 8, pad128(2W)) f32
    (sublane padding 2->8) and double-buffered; keep in+out blocks under
    `budget_bytes` so the kernel fits every generation's default scoped VMEM.
    """
    lanes_out = _round_up(max(2 * W, 128), 128)
    lanes_in = _round_up(max(W, 128), 128)

    def footprint(tr):
        out_blk = tr * 8 * lanes_out * 4
        in_blk = _round_up(tr, 8) * lanes_in * 4
        return 2 * (out_blk + in_blk)                # double-buffered in/out

    tr = min(_round_up(R, 8), 1024)
    while tr > 8 and footprint(tr) > budget_bytes:
        tr = max(8, _round_up(tr // 2, 8))
    return tr


def upsample_nearest2x_pallas(x):
    """Nearest-neighbour 2x upsample of an NCHW float32 tensor (Pallas TPU)."""
    B, C, H, W = x.shape
    if x.dtype != jnp.float32:
        raise NotImplementedError("float32 inputs only")

    R = B * C * H
    W2 = 2 * W

    tr = _pick_block_rows(R, W)
    R_pad = _round_up(R, tr)

    x2 = x.reshape(R, W)                              # free reshape (row-major)
    if R_pad != R:
        x2 = jnp.pad(x2, ((0, R_pad - R), (0, 0)))

    # One-hot column-duplication matrix, exactly representable in bf16.
    expand = (jnp.arange(W)[:, None] == (jnp.arange(W2)[None, :] // 2)
              ).astype(jnp.bfloat16)                  # (W, 2W)

    grid = (R_pad // tr,)
    out = pl.pallas_call(
        _upsample2x_kernel,
        out_shape=jax.ShapeDtypeStruct((R_pad, 2, W2), x.dtype),
        grid_spec=pltpu.PrefetchScalarGridSpec(
            num_scalar_prefetch=0,
            grid=grid,
            in_specs=[
                pl.BlockSpec((tr, W), lambda i: (i, 0)),     # x rows
                pl.BlockSpec((W, W2), lambda i: (0, 0)),     # constant expand matrix
            ],
            out_specs=pl.BlockSpec((tr, 2, W2), lambda i: (i, 0, 0)),
        ),
        compiler_params=pltpu.CompilerParams(
            dimension_semantics=("parallel",),        # megacore / both v7x TCs
            vmem_limit_bytes=32 * 1024 * 1024,
        ),
    )(x2, expand)

    if R_pad != R:
        out = out[:R]
    # (R, 2, 2W) -> (B, C, 2H, 2W): free, row-major layouts are identical.
    return out.reshape(B, C, 2 * H, 2 * W)


def upsample_forward(x, *, with_conv=False, fir=False, fir_kernel=(1, 3, 3, 1)):
    """Forward of layerspp.Upsample at its default configuration."""
    if fir or with_conv:
        # TODO(synk): fir / with_conv branches not implemented (see header).
        raise NotImplementedError(
            "Only the default Upsample path (fir=False, with_conv=False) is implemented.")
    return upsample_nearest2x_pallas(x)


def upsample_reference(x):
    """Pure-JAX reference matching F.interpolate(x, (2H, 2W), 'nearest')."""
    return jnp.repeat(jnp.repeat(x, 2, axis=2), 2, axis=3)


if __name__ == "__main__":
    key = jax.random.PRNGKey(0)
    B, C, H, W = 2, 4, 16, 16
    x = jax.random.normal(key, (B, C, H, W), jnp.float32)

    out = jax.block_until_ready(jax.jit(upsample_forward)(x))
    ref = jax.block_until_ready(upsample_reference(x))

    assert out.shape == (B, C, 2 * H, 2 * W), out.shape
    max_err = float(jnp.max(jnp.abs(out - ref)))
    assert jnp.allclose(out, ref, atol=1e-5, rtol=1e-5), max_err

    print("KERNEL_OK")
</pallas_src>

<mosaic_0001>
module attributes {stable_mosaic.version = 11 : i64} {
  func.func @_upsample2x_kernel(%arg0: i32, %arg1: memref<128x16xf32, #tpu.memory_space<vmem>>, %arg2: memref<16x32xbf16, #tpu.memory_space<vmem>>, %arg3: memref<128x2x32xf32, #tpu.memory_space<vmem>>) attributes {dimension_semantics = [#tpu.dimension_semantics<parallel>], iteration_bounds = array<i64: 1>, scalar_prefetch = 0 : i64, scratch_operands = 0 : i64, tpu.core_type = #tpu.core_type<tc>, window_params = [{transform_indices = @transform_0, window_bounds = array<i64: 128, 16>}, {pipeline_mode = #tpu.pipeline_mode<synchronous>, transform_indices = @transform_1, window_bounds = array<i64: 16, 32>}, {transform_indices = @transform_2, window_bounds = array<i64: 128, 2, 32>}]} {
    %c0 = arith.constant 0 : index
    %c0_0 = arith.constant 0 : index
    %0 = vector.load %arg1[%c0, %c0_0] : memref<128x16xf32, #tpu.memory_space<vmem>>, vector<128x16xf32>
    %c0_1 = arith.constant 0 : index
    %c0_2 = arith.constant 0 : index
    %1 = vector.load %arg2[%c0_1, %c0_2] : memref<16x32xbf16, #tpu.memory_space<vmem>>, vector<16x32xbf16>
    %2 = tpu.bitcast %0 : vector<128x16xf32> -> vector<128x16xi32>
    %c-65536_i32 = arith.constant -65536 : i32
    %3 = vector.broadcast %c-65536_i32 : i32 to vector<128x16xi32>
    %4 = arith.andi %2, %3 : vector<128x16xi32>
    %5 = tpu.bitcast %4 : vector<128x16xi32> -> vector<128x16xf32>
    %6 = arith.subf %0, %5 : vector<128x16xf32>
    %7 = tpu.bitcast %6 : vector<128x16xf32> -> vector<128x16xi32>
    %c-65536_i32_3 = arith.constant -65536 : i32
    %8 = vector.broadcast %c-65536_i32_3 : i32 to vector<128x16xi32>
    %9 = arith.andi %7, %8 : vector<128x16xi32>
    %10 = tpu.bitcast %9 : vector<128x16xi32> -> vector<128x16xf32>
    %11 = arith.subf %6, %10 : vector<128x16xf32>
    %12 = arith.truncf %5 : vector<128x16xf32> to vector<128x16xbf16>
    %cst = arith.constant dense<0.000000e+00> : vector<128x32xf32>
    %13 = tpu.matmul %12, %1, %cst {dimension_numbers = #tpu.dot_dimension_numbers<[1], [0], [0], [1], [0, 0, 1, 1], [], []>} : vector<128x16xbf16>, vector<16x32xbf16>, vector<128x32xf32> -> vector<128x32xf32>
    %14 = arith.truncf %10 : vector<128x16xf32> to vector<128x16xbf16>
    %cst_4 = arith.constant dense<0.000000e+00> : vector<128x32xf32>
    %15 = tpu.matmul %14, %1, %cst_4 {dimension_numbers = #tpu.dot_dimension_numbers<[1], [0], [0], [1], [0, 0, 1, 1], [], []>} : vector<128x16xbf16>, vector<16x32xbf16>, vector<128x32xf32> -> vector<128x32xf32>
    %16 = arith.addf %13, %15 : vector<128x32xf32>
    %17 = arith.truncf %11 : vector<128x16xf32> to vector<128x16xbf16>
    %cst_5 = arith.constant dense<0.000000e+00> : vector<128x32xf32>
    %18 = tpu.matmul %17, %1, %cst_5 {dimension_numbers = #tpu.dot_dimension_numbers<[1], [0], [0], [1], [0, 0, 1, 1], [], []>} : vector<128x16xbf16>, vector<16x32xbf16>, vector<128x32xf32> -> vector<128x32xf32>
    %19 = arith.addf %16, %18 : vector<128x32xf32>
    %c0_6 = arith.constant 0 : index
    %c0_7 = arith.constant 0 : index
    %c0_8 = arith.constant 0 : index
    %20 = vector.load %arg3[%c0_6, %c0_7, %c0_8] : memref<128x2x32xf32, #tpu.memory_space<vmem>>, vector<128x1x32xf32>
    %21 = vector.shape_cast %20 : vector<128x1x32xf32> to vector<128x32xf32>
    %22 = vector.shape_cast %19 : vector<128x32xf32> to vector<128x1x32xf32>
    tpu.vector_store %arg3[%c0_6, %c0_7, %c0_8], %22 {strides = array<i32>} : memref<128x2x32xf32, #tpu.memory_space<vmem>>, vector<128x1x32xf32>,
    %c0_9 = arith.constant 0 : index
    %c1 = arith.constant 1 : index
    %c0_10 = arith.constant 0 : index
    %23 = vector.load %arg3[%c0_9, %c1, %c0_10] : memref<128x2x32xf32, #tpu.memory_space<vmem>>, vector<128x1x32xf32>
    %24 = vector.shape_cast %23 : vector<128x1x32xf32> to vector<128x32xf32>
    %25 = vector.shape_cast %19 : vector<128x32xf32> to vector<128x1x32xf32>
    tpu.vector_store %arg3[%c0_9, %c1, %c0_10], %25 {strides = array<i32>} : memref<128x2x32xf32, #tpu.memory_space<vmem>>, vector<128x1x32xf32>,
    return
  }
  func.func @transform_0(%arg0: i32) -> (i32, i32) {
    %c0_i32 = arith.constant 0 : i32
    %c0_i32_0 = arith.constant 0 : i32
    return %arg0, %c0_i32 : i32, i32
  }
  func.func @transform_1(%arg0: i32) -> (i32, i32) {
    %c0_i32 = arith.constant 0 : i32
    %c0_i32_0 = arith.constant 0 : i32
    %c0_i32_1 = arith.constant 0 : i32
    return %c0_i32, %c0_i32_0 : i32, i32
  }
  func.func @transform_2(%arg0: i32) -> (i32, i32, i32) {
    %c0_i32 = arith.constant 0 : i32
    %c0_i32_0 = arith.constant 0 : i32
    %c0_i32_1 = arith.constant 0 : i32
    return %arg0, %c0_i32, %c0_i32_0 : i32, i32, i32
  }
}

</mosaic_0001>

<bundles_post_ra>
// kernel: upsample_forward.1
= control target key start
LH: loop header
LB: loop body
LE: loop exit
PB: predicated region body
PF: predicated region fallthrough
CT: control target
= control target key end

     0   :  { %7 = vsyncpa [#allocation3], 0  ;;  %s2509_s0 = inlined_call_operand.hbm [shape: f32[128,16], index: 0, kind: input, shape index: {}]   ;;  %s2510_s1 = inlined_call_operand.vmem [shape: bf16[16,32], index: 1, kind: input, shape index: {}]   ;;  %s2511_s2 = inlined_call_operand.hbm [shape: f32[128,2,32], index: 2, kind: output, shape index: {}]  }
   0x1   :  { %8 = vsyncpa [#allocation4], 0  ;;  %s1981_s9 = smov [#allocation2]   ;;  %s1933_s13 = scalar_lea.hbm %s2509_s0, 2048 }
   0x2   :  { %s14_s10 = sshll.u32 %s1981_s9, 4  ;;  %p1934_p0 = scmp.ne.s32.totalorder %s2509_s0, %s1933_s13  ;;  %s15_s10 = int_to_ptr.vmem [resolvable:$true] %s14_s10 }
   0x3   :  { %p1937_p1 = scmp.lt.u32.totalorder %s1933_s13, %s2509_s0 }
   0x5   :  { %p1939_p2 = pnand %p1937_p1, %p1934_p0 }
   0x7   :  { %1942 = shalt.err (!%p1939_p2)
}
   0x8   :  { %s1943_s18 = scalar_lea.vmem %s15_s10, 2048  ;;  %p1948_p4 = scmp.lt.s32.totalorder %s15_s10, %s15_s10 }
   0x9   :  { %p1944_p3 = scmp.ne.s32.totalorder %s15_s10, %s1943_s18  ;;  %p1949_p5 = scmp.lt.s32.totalorder %s1943_s18, %s1943_s18 }
   0xb   :  { %p1950_p6 = por %p1949_p5, %p1948_p4 }
   0xd   :  { %p1951_p7 = pnand %p1950_p6, %p1944_p3 }
   0xf   :  { %1954 = shalt.err (!%p1951_p7)
}
  0x10   :  { %s1982_s19 = smov 128   ;;  %s1983_s20 = smov 8  }
  0x11   :  { %20 = dma.hbm_to_vmem [thread:$0]  %s2509_s0, 2048, %s15_s10, [#allocation3], %s1982_s19, %s1982_s19, %s1983_s20  }
  0x12   :  { %1977 = dma.done.wait [#allocation3], 2048  }
  0x13   :  { %1978 = vsyncadd [#allocation3], 4294965248  ;;  %v1932_v0 = vld [vmem:[%s2510_s1] sm:$0xff]   ;;  %v28_v2 = vld [vmem:[#allocation2 + $0x8] sm:$0xff]  ;;  %vm195_vm0 = vcmask 130048   ;;  %vm1511_vm1 = vcmask 253952  }
  0x14   :  { %v27_v1 = vld [vmem:[#allocation2] sm:$0xff]  ;;  %v29_v3 = vld [vmem:[#allocation2 + $0x10] sm:$0xff]  ;;  %1855 = vmatprep.subr.bf16.mxu0 %v1932_v0  ;;  %1837 = vmatprep.subr.bf16.mxu1 %v1932_v0  ;;  %v62_v5 = vand.u32 4294901760, %v28_v2  ;;  %v30_v6 = vld [vmem:[#allocation2 + $0x18] sm:$0xff]  ;;  %s1985_s0 = smov [#allocation5]  }
  0x15   :  { %v61_v4 = vand.u32 4294901760, %v27_v1  ;;  %v63_v7 = vand.u32 4294901760, %v29_v3  ;;  %v31_v8 = vld [vmem:[#allocation2 + $0x20] sm:$0xff]  ;;  %v32_v9 = vld [vmem:[#allocation2 + $0x28] sm:$0xff]  ;;  %1856 = vmatpush3.bf16.msra.mxu0 %v1932_v0  ;;  %1838 = vmatpush3.bf16.msra.mxu1 %v1932_v0  ;;  %v64_v10 = vand.u32 4294901760, %v30_v6  ;;  %v33_v13 = vld [vmem:[#allocation2 + $0x30] sm:$0xff] }
  0x16   :  { %v65_v11 = vand.u32 4294901760, %v31_v8  ;;  %v66_v12 = vand.u32 4294901760, %v32_v9  ;;  %v34_v14 = vld [vmem:[#allocation2 + $0x38] sm:$0xff]  ;;  %v94_v17 = vsub.f32 %v28_v2, %v62_v5  ;;  %1891 = vmatprep.subr.bf16.mxu1 %v1932_v0  ;;  %1873 = vmatprep.subr.bf16.mxu0 %v1932_v0  ;;  %v67_v18 = vand.u32 4294901760, %v33_v13  ;;  %v2021_v35 = vld [vmem:[#allocation2 + $0x40] sm:$0xff]  ;;  %v2023_v36 = vld [vmem:[#allocation2 + $0x48] sm:$0xff] }
  0x17   :  { %v173_v15 = vpack.c.bf16 %v62_v5, %v61_v4  ;;  %v93_v16 = vsub.f32 %v27_v1, %v61_v4  ;;  %v174_v19 = vpack.c.bf16 %v64_v10, %v63_v7  ;;  %v95_v20 = vsub.f32 %v29_v3, %v63_v7  ;;  %v2025_v37 = vld [vmem:[#allocation2 + $0x50] sm:$0xff]  ;;  %v2027_v39 = vld [vmem:[#allocation2 + $0x58] sm:$0xff]  ;;  %v2037_v53 = vld [vmem:[#allocation2 + $0x60] sm:$0xff]  ;;  %s1773_s1 = sshll.u32 %s1985_s0, 4  ;;  %s1774_s1 = int_to_ptr.vmem [resolvable:$true] %s1773_s1 }
  0x18   :  { %v96_v21 = vsub.f32 %v30_v6, %v64_v10  ;;  %v175_v22 = vpack.c.bf16 %v66_v12, %v65_v11  ;;  %v126_v24 = vand.u32 4294901760, %v94_v17  ;;  %v68_v25 = vand.u32 4294901760, %v34_v14  ;;  %v2039_v54 = vld [vmem:[#allocation2 + $0x68] sm:$0xff]  ;;  %v41_v2 = vld [vmem:[#allocation2 + $0x70] sm:$0xff]  ;;  %v42_v3 = vld [vmem:[#allocation2 + $0x78] sm:$0xff]  ;;  %s1955_s25 = scalar_lea.vmem %s1774_s1, 4096  ;;  %p1960_p9 = scmp.lt.s32.totalorder %s1774_s1, %s1774_s1 }
  0x19   :  { %1857 = vmatprep.mubr.msk.bf16.mxu0 %vm195_vm0, %v173_v15  ;;  %v125_v23 = vand.u32 4294901760, %v93_v16  ;;  %v97_v26 = vsub.f32 %v31_v8, %v65_v11  ;;  %v127_v27 = vand.u32 4294901760, %v95_v20  ;;  %v98_v29 = vsub.f32 %v32_v9, %v66_v12  ;;  %p1956_p8 = scmp.ne.s32.totalorder %s1774_s1, %s1955_s25  ;;  %p1961_p10 = scmp.lt.s32.totalorder %s1955_s25, %s1955_s25 }
  0x1a   :  { %1858 = vmatmul.mubr.msk.bf16.vlgmr.msra.gmra.mrb[0].mxu0 %vm195_vm0, %v174_v19  ;;  %v128_v28 = vand.u32 4294901760, %v96_v21  ;;  %v99_v30 = vsub.f32 %v33_v13, %v67_v18  ;;  %v158_v32 = vsub.f32 %v94_v17, %v126_v24  ;;  %v176_v40 = vpack.c.bf16 %v68_v25, %v67_v18 }
  0x1b   :  { %v157_v31 = vsub.f32 %v93_v16, %v125_v23  ;;  %v181_v33 = vpack.c.bf16 %v126_v24, %v125_v23  ;;  %1874 = vmatpush3.bf16.msra.mxu0 %v1932_v0  ;;  %1861 = vmatprep.mubr.msk.bf16.mxu0 %vm195_vm0, %v175_v22  ;;  %v129_v34 = vand.u32 4294901760, %v97_v26  ;;  %v130_v41 = vand.u32 4294901760, %v98_v29  ;;  %p1962_p11 = por %p1961_p10, %p1960_p9 }
  0x1c   :  { %v182_v38 = vpack.c.bf16 %v128_v28, %v127_v27  ;;  %v100_v42 = vsub.f32 %v34_v14, %v68_v25  ;;  %v131_v43 = vand.u32 4294901760, %v99_v30  ;;  %v69_v44 = vand.u32 4294901760, %v2021_v35 }
  0x1d   :  { %1839 = vmatprep.mubr.msk.bf16.mxu1 %vm195_vm0, %v181_v33  ;;  %v70_v45 = vand.u32 4294901760, %v2023_v36  ;;  %v71_v46 = vand.u32 4294901760, %v2025_v37  ;;  %v183_v47 = vpack.c.bf16 %v130_v41, %v129_v34  ;;  %v438_v49 = vpack.c.bf16 %v158_v32, %v157_v31  ;;  %p1963_p12 = pnand %p1962_p11, %p1956_p8 }
  0x1e   :  { %1840 = vmatmul.mubr.msk.bf16.vlgmr.msra.gmra.mrb[0].mxu1 %vm195_vm0, %v182_v38  ;;  %v132_v48 = vand.u32 4294901760, %v100_v42  ;;  %v72_v50 = vand.u32 4294901760, %v2027_v39  ;;  %v101_v51 = vsub.f32 %v2021_v35, %v69_v44  ;;  %v159_v55 = vsub.f32 %v95_v20, %v127_v27 }
  0x1f   :  { %1892 = vmatpush3.bf16.msra.mxu1 %v1932_v0  ;;  %v102_v52 = vsub.f32 %v2023_v36, %v70_v45  ;;  %v160_v56 = vsub.f32 %v96_v21, %v128_v28  ;;  %1843 = vmatprep.mubr.msk.bf16.mxu1 %vm195_vm0, %v183_v47  ;;  %v103_v57 = vsub.f32 %v2025_v37, %v71_v46  ;;  %v73_v0 = vand.u32 4294901760, %v2037_v53 }
  0x20   :  { %v184_v58 = vpack.c.bf16 %v132_v48, %v131_v43  ;;  %v133_v59 = vand.u32 4294901760, %v101_v51  ;;  %v104_v61 = vsub.f32 %v2027_v39, %v72_v50  ;;  %v161_v62 = vsub.f32 %v97_v26, %v129_v34 }
  0x21   :  { %v134_v60 = vand.u32 4294901760, %v102_v52  ;;  %v162_v63 = vsub.f32 %v98_v29, %v130_v41  ;;  %v74_v1 = vand.u32 4294901760, %v2039_v54  ;;  %v439_v5 = vpack.c.bf16 %v160_v56, %v159_v55 }
  0x22   :  { %1862 = vmatmul.mubr.msk.bf16.gmra.mrb[4].mxu0 %vm195_vm0, %v176_v40  ;;  %v105_v6 = vsub.f32 %v2037_v53, %v73_v0  ;;  %v135_v8 = vand.u32 4294901760, %v103_v57  ;;  %v136_v9 = vand.u32 4294901760, %v104_v61  ;;  %v75_v10 = vand.u32 4294901760, %v41_v2 }
  0x23   :  { %1875 = vmatprep.mubr.msk.bf16.mxu0 %vm195_vm0, %v438_v49  ;;  %v185_v4 = vpack.c.bf16 %v134_v60, %v133_v59  ;;  %v106_v7 = vsub.f32 %v2039_v54, %v74_v1  ;;  %v76_v11 = vand.u32 4294901760, %v42_v3  ;;  %v440_v12 = vpack.c.bf16 %v162_v63, %v161_v62 }
  0x24   :  { %v137_v13 = vand.u32 4294901760, %v105_v6  ;;  %v163_v15 = vsub.f32 %v99_v30, %v131_v43  ;;  %v186_v16 = vpack.c.bf16 %v136_v9, %v135_v8  ;;  %v164_v17 = vsub.f32 %v100_v42, %v132_v48 }
  0x25   :  { %v138_v14 = vand.u32 4294901760, %v106_v7  ;;  %v107_v18 = vsub.f32 %v41_v2, %v75_v10  ;;  %v108_v19 = vsub.f32 %v42_v3, %v76_v11  ;;  %v165_v21 = vsub.f32 %v101_v51, %v133_v59 }
  0x26   :  { %1844 = vmatmul.mubr.msk.bf16.gmra.mrb[4].mxu1 %vm195_vm0, %v184_v58  ;;  %v166_v22 = vsub.f32 %v102_v52, %v134_v60  ;;  %v441_v23 = vpack.c.bf16 %v164_v17, %v163_v15  ;;  %v167_v28 = vsub.f32 %v103_v57, %v135_v8  ;;  %v168_v29 = vsub.f32 %v104_v61, %v136_v9 }
  0x27   :  { %1847 = vmatprep.mubr.msk.bf16.mxu1 %vm195_vm0, %v185_v4  ;;  %v187_v20 = vpack.c.bf16 %v138_v14, %v137_v13  ;;  %v139_v24 = vand.u32 4294901760, %v107_v18  ;;  %v140_v25 = vand.u32 4294901760, %v108_v19  ;;  %v177_v30 = vpack.c.bf16 %v70_v45, %v69_v44 }
  0x28   :  { %v442_v26 = vpack.c.bf16 %v166_v22, %v165_v21  ;;  %v169_v31 = vsub.f32 %v105_v6, %v137_v13  ;;  %v170_v32 = vsub.f32 %v106_v7, %v138_v14  ;;  %v443_v33 = vpack.c.bf16 %v168_v29, %v167_v28 }
  0x29   :  { %v188_v27 = vpack.c.bf16 %v140_v25, %v139_v24  ;;  %v178_v35 = vpack.c.bf16 %v72_v50, %v71_v46  ;;  %v171_v36 = vsub.f32 %v107_v18, %v139_v24  ;;  %v172_v38 = vsub.f32 %v108_v19, %v140_v25 }
  0x2a   :  { %1876 = vmatmul.mubr.msk.bf16.vlgmr.msra.gmra.mrb[0].mxu0 %vm195_vm0, %v439_v5  ;;  %v444_v34 = vpack.c.bf16 %v170_v32, %v169_v31  ;;  %v179_v39 = vpack.c.bf16 %v74_v1, %v73_v0  ;;  %v180_v41 = vpack.c.bf16 %v76_v11, %v75_v10  ;;  %v1984_v45 = vmov 1966171168  }
  0x2b   :  { %1879 = vmatprep.mubr.msk.bf16.mxu0 %vm195_vm0, %v440_v12  ;;  %v445_v40 = vpack.c.bf16 %v172_v38, %v171_v36  ;;  %v601_v46 = vunpack.c.l.s4 %v1984_v45  ;;  %v603_v47 = vlaneseq }
  0x2d   :  { %v602_v48 = vunpack.c.0.s8 %v601_v46  ;;  %v604_v49 = vshrl.u32 %v603_v47, 7 }
  0x2e   :  { %1848 = vmatmul.mubr.msk.bf16.gmra.mrb[8].mxu1 %vm195_vm0, %v186_v16 }
  0x2f   :  { %1851 = vmatprep.mubr.msk.bf16.mxu1 %vm195_vm0, %v187_v20  ;;  %v2078_v54 = vsub.s32 %v602_v48, %v604_v49 }
  0x32   :  { %1880 = vmatmul.mubr.msk.bf16.gmra.mrb[4].mxu0 %vm195_vm0, %v441_v23 }
  0x33   :  { %1883 = vmatprep.mubr.msk.bf16.mxu0 %vm195_vm0, %v442_v26 }
  0x36   :  { %1852 = vmatmul.mubr.msk.bf16.gmra.mrb[12].mxu1 %vm195_vm0, %v188_v27 }
  0x37   :  { %1865 = vmatprep.mubr.msk.bf16.mxu1 %vm195_vm0, %v177_v30 }
  0x3a   :  { %1884 = vmatmul.mubr.msk.bf16.gmra.mrb[8].mxu0 %vm195_vm0, %v443_v33 }
  0x3b   :  { %1887 = vmatprep.mubr.msk.bf16.mxu0 %vm195_vm0, %v444_v34 }
  0x3e   :  { %1866 = vmatmul.mubr.msk.bf16.vlgmr.msra.gmra.mrb[8].mxu1 %vm195_vm0, %v178_v35 }
  0x3f   :  { %1869 = vmatprep.mubr.msk.bf16.mxu1 %vm195_vm0, %v179_v39 }
  0x42   :  { %1888 = vmatmul.mubr.msk.bf16.gmra.mrb[12].mxu0 %vm195_vm0, %v445_v40 }
  0x46   :  { %1870 = vmatmul.mubr.msk.bf16.gmra.mrb[12].mxu1 %vm195_vm0, %v180_v41 }
  0xf1   :  { %v1841_v42 = vpop.f32.mrb[0].mxu1 }
  0xf2   :  { %v254_v37 = vpop.f32.mrb[1].mxu1 }
  0xf3   :  { %v1842_v43 = vpop.f32.mrb[2].mxu1 }
  0xf4   :  { %v257_v44 = vpop.f32.mrb[3].mxu1 }
  0xf9   :  { %v2070_v50 = vpop.f32.mrb[4].mxu1 }
  0xfa   :  { %v2072_v51 = vpop.f32.mrb[5].mxu1 }
  0xfb   :  { %v2074_v52 = vpop.f32.mrb[6].mxu1 }
  0xfc   :  { %v2076_v53 = vpop.f32.mrb[7].mxu1 }
  0xfd   :  { %v1877_v55 = vpop.f32.mrb[0].mxu0 }
  0xfe   :  { %v1893_v56 = vadd.f32 %v1877_v55, %v1841_v42  ;;  %v504_v57 = vpop.f32.mrb[1].mxu0 }
  0xff   :  { %v1894_v58 = vadd.f32 %v504_v57, %v254_v37  ;;  %v1878_v59 = vpop.f32.mrb[2].mxu0 }
 0x100   :  { %v697_v60 = vcombine.high %v1893_v56, %v1893_v56  ;;  %v704_v61 = vrot.slane %v1893_v56, %v2078_v54  ;;  %v1895_v62 = vadd.f32 %v1878_v59, %v1842_v43  ;;  %v507_v63 = vpop.f32.mrb[3].mxu0 }
 0x101   :  { %v599_v0 = vcombine.high %v1894_v58, %v1894_v58  ;;  %v606_v1 = vrot.slane %v1894_v58, %v2078_v54  ;;  %v2082_v2 = vadd.f32 %v507_v63, %v257_v44 }
 0x102   :  { %v711_v3 = vrot.slane %v697_v60, %v2078_v54  ;;  %v712_v4 = vcombine.high %v704_v61, %v704_v61  ;;  %v720_v5 = vrot.slane %v704_v61, %v2078_v54  ;;  %v746_v6 = vcombine.high %v1895_v62, %v1895_v62 }
 0x103   :  { %v613_v7 = vrot.slane %v599_v0, %v2078_v54  ;;  %v614_v8 = vcombine.high %v606_v1, %v606_v1  ;;  %v622_v9 = vrot.slane %v606_v1, %v2078_v54  ;;  %v753_v10 = vrot.slane %v1895_v62, %v2078_v54 }
 0x104   :  { %v713_v11 = vcombine.high %v711_v3, %v711_v3  ;;  %v727_v12 = vrot.slane %v711_v3, %v2078_v54  ;;  %v734_v13 = vrot.slane %v712_v4, %v2078_v54  ;;  %v742_v14 = vcombine.high %v720_v5, %v720_v5  ;;  %1528 = vst.msk [vmem:[#allocation5 + $0x20] sm:$0x1] %vm1511_vm1, %v720_v5 }
 0x105   :  { %1656 = vst.msk [vmem:[#allocation5 + $0x21] sm:$0x1] %vm1511_vm1, %v720_v5  ;;  %v615_v15 = vcombine.high %v613_v7, %v613_v7  ;;  %v629_v16 = vrot.slane %v613_v7, %v2078_v54  ;;  %v636_v17 = vrot.slane %v614_v8, %v2078_v54  ;;  %v644_v18 = vcombine.high %v622_v9, %v622_v9  ;;  %v1881_v19 = vpop.f32.mrb[4].mxu0 }
 0x106   :  { %1512 = vst.msk [vmem:[#allocation5] sm:$0x1] %vm1511_vm1, %v622_v9  ;;  %1640 = vst.msk [vmem:[#allocation5 + $0x1] sm:$0x1] %vm1511_vm1, %v622_v9  ;;  %v741_v20 = vrot.slane %v713_v11, %v2078_v54  ;;  %v743_v21 = vcombine.high %v727_v12, %v727_v12  ;;  %v744_v22 = vcombine.high %v734_v13, %v734_v13  ;;  %v520_v24 = vpop.f32.mrb[5].mxu0 }
 0x107   :  { %1529 = vst.msk [vmem:[#allocation5 + $0x22] sm:$0x1] %vm1511_vm1, %v734_v13  ;;  %1530 = vst.msk [vmem:[#allocation5 + $0x24] sm:$0x1] %vm1511_vm1, %v742_v14  ;;  %v760_v23 = vrot.slane %v746_v6, %v2078_v54  ;;  %v643_v25 = vrot.slane %v615_v15, %v2078_v54  ;;  %v645_v26 = vcombine.high %v629_v16, %v629_v16  ;;  %v2112_v29 = vpop.f32.mrb[6].mxu0 }
 0x108   :  { %1532 = vst.msk [vmem:[#allocation5 + $0x28] sm:$0x1] %vm1511_vm1, %v727_v12  ;;  %1657 = vst.msk [vmem:[#allocation5 + $0x23] sm:$0x1] %vm1511_vm1, %v734_v13  ;;  %v646_v27 = vcombine.high %v636_v17, %v636_v17  ;;  %v761_v28 = vcombine.high %v753_v10, %v753_v10  ;;  %v745_v30 = vcombine.high %v741_v20, %v741_v20  ;;  %v2122_v34 = vpop.f32.mrb[7].mxu0 }
 0x109   :  { %1658 = vst.msk [vmem:[#allocation5 + $0x25] sm:$0x1] %vm1511_vm1, %v742_v14  ;;  %1660 = vst.msk [vmem:[#allocation5 + $0x29] sm:$0x1] %vm1511_vm1, %v727_v12  ;;  %v762_v31 = vcombine.high %v760_v23, %v760_v23  ;;  %v769_v32 = vrot.slane %v753_v10, %v2078_v54  ;;  %v776_v33 = vrot.slane %v760_v23, %v2078_v54 }
 0x10a   :  { %1513 = vst.msk [vmem:[#allocation5 + $0x2] sm:$0x1] %vm1511_vm1, %v636_v17  ;;  %1514 = vst.msk [vmem:[#allocation5 + $0x4] sm:$0x1] %vm1511_vm1, %v644_v18  ;;  %v647_v35 = vcombine.high %v643_v25, %v643_v25  ;;  %v783_v36 = vrot.slane %v761_v28, %v2078_v54  ;;  %v648_v38 = vcombine.high %v2082_v2, %v2082_v2 }
 0x10b   :  { %1516 = vst.msk [vmem:[#allocation5 + $0x8] sm:$0x1] %vm1511_vm1, %v629_v16  ;;  %1641 = vst.msk [vmem:[#allocation5 + $0x3] sm:$0x1] %vm1511_vm1, %v636_v17  ;;  %v655_v39 = vrot.slane %v2082_v2, %v2078_v54  ;;  %v790_v40 = vrot.slane %v762_v31, %v2078_v54  ;;  %v791_v41 = vcombine.high %v769_v32, %v769_v32 }
 0x10c   :  { %1642 = vst.msk [vmem:[#allocation5 + $0x5] sm:$0x1] %vm1511_vm1, %v644_v18  ;;  %1644 = vst.msk [vmem:[#allocation5 + $0x9] sm:$0x1] %vm1511_vm1, %v629_v16  ;;  %v792_v42 = vcombine.high %v776_v33, %v776_v33  ;;  %v1897_v37 = vadd.f32 %v1881_v19, %v2070_v50  ;;  %v793_v43 = vcombine.high %v783_v36, %v783_v36 }
 0x10d   :  { %1531 = vst.msk [vmem:[#allocation5 + $0x26] sm:$0x1] %vm1511_vm1, %v744_v22  ;;  %1533 = vst.msk [vmem:[#allocation5 + $0x2a] sm:$0x1] %vm1511_vm1, %v741_v20  ;;  %v662_v44 = vrot.slane %v648_v38, %v2078_v54  ;;  %v663_v45 = vcombine.high %v655_v39, %v655_v39  ;;  %v671_v46 = vrot.slane %v655_v39, %v2078_v54  ;;  %v2163_v59 = vpop.f32.mrb[8].mxu0 }
 0x10e   :  { %1534 = vst.msk [vmem:[#allocation5 + $0x2c] sm:$0x1] %vm1511_vm1, %v743_v21  ;;  %1659 = vst.msk [vmem:[#allocation5 + $0x27] sm:$0x1] %vm1511_vm1, %v744_v22  ;;  %v794_v47 = vcombine.high %v790_v40, %v790_v40  ;;  %v893_v48 = vcombine.high %v1897_v37, %v1897_v37  ;;  %v900_v49 = vrot.slane %v1897_v37, %v2078_v54  ;;  %v2169_v63 = vpop.f32.mrb[9].mxu0 }
 0x10f   :  { %1661 = vst.msk [vmem:[#allocation5 + $0x2b] sm:$0x1] %vm1511_vm1, %v741_v20  ;;  %1662 = vst.msk [vmem:[#allocation5 + $0x2d] sm:$0x1] %vm1511_vm1, %v743_v21  ;;  %v1898_v50 = vadd.f32 %v520_v24, %v2072_v51  ;;  %v664_v55 = vcombine.high %v662_v44, %v662_v44  ;;  %v678_v56 = vrot.slane %v662_v44, %v2078_v54  ;;  %v2179_v4 = vpop.f32.mrb[10].mxu0 }
 0x110   :  { %1515 = vst.msk [vmem:[#allocation5 + $0x6] sm:$0x1] %vm1511_vm1, %v646_v27  ;;  %1517 = vst.msk [vmem:[#allocation5 + $0xa] sm:$0x1] %vm1511_vm1, %v643_v25  ;;  %v685_v57 = vrot.slane %v663_v45, %v2078_v54  ;;  %v693_v58 = vcombine.high %v671_v46, %v671_v46  ;;  %v907_v51 = vrot.slane %v893_v48, %v2078_v54  ;;  %v2185_v9 = vpop.f32.mrb[11].mxu0 }
 0x111   :  { %1518 = vst.msk [vmem:[#allocation5 + $0xc] sm:$0x1] %vm1511_vm1, %v645_v26  ;;  %1643 = vst.msk [vmem:[#allocation5 + $0x7] sm:$0x1] %vm1511_vm1, %v646_v27  ;;  %v908_v60 = vcombine.high %v900_v49, %v900_v49  ;;  %v916_v61 = vrot.slane %v900_v49, %v2078_v54  ;;  %v795_v62 = vcombine.high %v1898_v50, %v1898_v50  ;;  %v1867_v14 = vpop.f32.mrb[8].mxu1 }
 0x112   :  { %1645 = vst.msk [vmem:[#allocation5 + $0xb] sm:$0x1] %vm1511_vm1, %v643_v25  ;;  %1646 = vst.msk [vmem:[#allocation5 + $0xd] sm:$0x1] %vm1511_vm1, %v645_v26  ;;  %v692_v0 = vrot.slane %v664_v55, %v2078_v54  ;;  %v694_v1 = vcombine.high %v678_v56, %v678_v56  ;;  %v695_v2 = vcombine.high %v685_v57, %v685_v57  ;;  %v2204_v19 = vpop.f32.mrb[9].mxu1 }
 0x113   :  { %1535 = vst.msk [vmem:[#allocation5 + $0x2e] sm:$0x1] %vm1511_vm1, %v745_v30  ;;  %1663 = vst.msk [vmem:[#allocation5 + $0x2f] sm:$0x1] %vm1511_vm1, %v745_v30  ;;  %v802_v3 = vrot.slane %v1898_v50, %v2078_v54  ;;  %v909_v5 = vcombine.high %v907_v51, %v907_v51  ;;  %v923_v6 = vrot.slane %v907_v51, %v2078_v54  ;;  %v2212_v24 = vpop.f32.mrb[10].mxu1 }
 0x114   :  { %1536 = vst.msk [vmem:[#allocation5 + $0x30] sm:$0x1] %vm1511_vm1, %v769_v32  ;;  %1540 = vst.msk [vmem:[#allocation5 + $0x38] sm:$0x1] %vm1511_vm1, %v776_v33  ;;  %v930_v7 = vrot.slane %v908_v60, %v2078_v54  ;;  %v938_v8 = vcombine.high %v916_v61, %v916_v61  ;;  %v696_v10 = vcombine.high %v692_v0, %v692_v0  ;;  %v2223_v28 = vpop.f32.mrb[11].mxu1 }
 0x115   :  { %1664 = vst.msk [vmem:[#allocation5 + $0x31] sm:$0x1] %vm1511_vm1, %v769_v32  ;;  %1668 = vst.msk [vmem:[#allocation5 + $0x39] sm:$0x1] %vm1511_vm1, %v776_v33  ;;  %v809_v11 = vrot.slane %v795_v62, %v2078_v54  ;;  %v810_v12 = vcombine.high %v802_v3, %v802_v3  ;;  %v818_v13 = vrot.slane %v802_v3, %v2078_v54  ;;  %v2233_v32 = vpop.f32.mrb[12].mxu0 }
 0x116   :  { %1519 = vst.msk [vmem:[#allocation5 + $0xe] sm:$0x1] %vm1511_vm1, %v647_v35  ;;  %1647 = vst.msk [vmem:[#allocation5 + $0xf] sm:$0x1] %vm1511_vm1, %v647_v35  ;;  %v937_v15 = vrot.slane %v909_v5, %v2078_v54  ;;  %v939_v16 = vcombine.high %v923_v6, %v923_v6  ;;  %v940_v17 = vcombine.high %v930_v7, %v930_v7  ;;  %v2239_v38 = vpop.f32.mrb[13].mxu0 }
 0x117   :  { %1537 = vst.msk [vmem:[#allocation5 + $0x32] sm:$0x1] %vm1511_vm1, %v783_v36  ;;  %1665 = vst.msk [vmem:[#allocation5 + $0x33] sm:$0x1] %vm1511_vm1, %v783_v36  ;;  %v1899_v18 = vadd.f32 %v2112_v29, %v2074_v52  ;;  %v811_v20 = vcombine.high %v809_v11, %v809_v11  ;;  %v825_v21 = vrot.slane %v809_v11, %v2078_v54  ;;  %v2249_v37 = vpop.f32.mrb[14].mxu0 }
 0x118   :  { %1538 = vst.msk [vmem:[#allocation5 + $0x34] sm:$0x1] %vm1511_vm1, %v791_v41  ;;  %1541 = vst.msk [vmem:[#allocation5 + $0x3a] sm:$0x1] %vm1511_vm1, %v790_v40  ;;  %v832_v22 = vrot.slane %v810_v12, %v2078_v54  ;;  %v840_v23 = vcombine.high %v818_v13, %v818_v13  ;;  %v941_v25 = vcombine.high %v937_v15, %v937_v15 }
 0x119   :  { %1542 = vst.msk [vmem:[#allocation5 + $0x3c] sm:$0x1] %vm1511_vm1, %v792_v42  ;;  %1666 = vst.msk [vmem:[#allocation5 + $0x35] sm:$0x1] %vm1511_vm1, %v791_v41  ;;  %v942_v52 = vcombine.high %v1899_v18, %v1899_v18  ;;  %v949_v26 = vrot.slane %v1899_v18, %v2078_v54  ;;  %v1900_v27 = vadd.f32 %v2122_v34, %v2076_v53 }
 0x11a   :  { %1669 = vst.msk [vmem:[#allocation5 + $0x3b] sm:$0x1] %vm1511_vm1, %v790_v40  ;;  %1670 = vst.msk [vmem:[#allocation5 + $0x3d] sm:$0x1] %vm1511_vm1, %v792_v42  ;;  %v839_v29 = vrot.slane %v811_v20, %v2078_v54  ;;  %v841_v30 = vcombine.high %v825_v21, %v825_v21  ;;  %v842_v31 = vcombine.high %v832_v22, %v832_v22 }
 0x11b   :  { %1539 = vst.msk [vmem:[#allocation5 + $0x36] sm:$0x1] %vm1511_vm1, %v793_v43  ;;  %1667 = vst.msk [vmem:[#allocation5 + $0x37] sm:$0x1] %vm1511_vm1, %v793_v43  ;;  %v1901_v53 = vadd.f32 %v2163_v59, %v1867_v14  ;;  %v956_v33 = vrot.slane %v942_v52, %v2078_v54  ;;  %v957_v34 = vcombine.high %v949_v26, %v949_v26 }
 0x11c   :  { %1520 = vst.msk [vmem:[#allocation5 + $0x10] sm:$0x1] %vm1511_vm1, %v671_v46  ;;  %1648 = vst.msk [vmem:[#allocation5 + $0x11] sm:$0x1] %vm1511_vm1, %v671_v46  ;;  %v965_v35 = vrot.slane %v949_v26, %v2078_v54  ;;  %v844_v36 = vcombine.high %v1900_v27, %v1900_v27  ;;  %v843_v39 = vcombine.high %v839_v29, %v839_v29 }
 0x11d   :  { %1543 = vst.msk [vmem:[#allocation5 + $0x3e] sm:$0x1] %vm1511_vm1, %v794_v47  ;;  %1671 = vst.msk [vmem:[#allocation5 + $0x3f] sm:$0x1] %vm1511_vm1, %v794_v47  ;;  %v851_v40 = vrot.slane %v1900_v27, %v2078_v54  ;;  %v1089_v41 = vcombine.high %v1901_v53, %v1901_v53  ;;  %v1096_v42 = vrot.slane %v1901_v53, %v2078_v54  ;;  %v2255_v47 = vpop.f32.mrb[15].mxu0 }
 0x11e   :  { %1521 = vst.msk [vmem:[#allocation5 + $0x12] sm:$0x1] %vm1511_vm1, %v685_v57  ;;  %1522 = vst.msk [vmem:[#allocation5 + $0x14] sm:$0x1] %vm1511_vm1, %v693_v58  ;;  %v958_v43 = vcombine.high %v956_v33, %v956_v33  ;;  %v972_v44 = vrot.slane %v956_v33, %v2078_v54  ;;  %v979_v45 = vrot.slane %v957_v34, %v2078_v54 }
 0x11f   :  { %1524 = vst.msk [vmem:[#allocation5 + $0x18] sm:$0x1] %vm1511_vm1, %v678_v56  ;;  %1649 = vst.msk [vmem:[#allocation5 + $0x13] sm:$0x1] %vm1511_vm1, %v685_v57  ;;  %v987_v46 = vcombine.high %v965_v35, %v965_v35  ;;  %v858_v48 = vrot.slane %v844_v36, %v2078_v54  ;;  %v859_v49 = vcombine.high %v851_v40, %v851_v40 }
 0x120   :  { %1650 = vst.msk [vmem:[#allocation5 + $0x15] sm:$0x1] %vm1511_vm1, %v693_v58  ;;  %1652 = vst.msk [vmem:[#allocation5 + $0x19] sm:$0x1] %vm1511_vm1, %v678_v56  ;;  %v867_v50 = vrot.slane %v851_v40, %v2078_v54  ;;  %v1103_v55 = vrot.slane %v1089_v41, %v2078_v54  ;;  %v2262_v56 = vpop.f32.mrb[12].mxu1  ;;  %v986_v57 = vrot.slane %v958_v43, %v2078_v54 }
 0x121   :  { %1560 = vst.msk [vmem:[#allocation5 + $0x60] sm:$0x1] %vm1511_vm1, %v916_v61  ;;  %1688 = vst.msk [vmem:[#allocation5 + $0x61] sm:$0x1] %vm1511_vm1, %v916_v61  ;;  %v988_v58 = vcombine.high %v972_v44, %v972_v44  ;;  %v989_v59 = vcombine.high %v979_v45, %v979_v45  ;;  %v1104_v51 = vcombine.high %v1096_v42, %v1096_v42  ;;  %v2271_v60 = vpop.f32.mrb[13].mxu1 }
 0x122   :  { %1523 = vst.msk [vmem:[#allocation5 + $0x16] sm:$0x1] %vm1511_vm1, %v695_v2  ;;  %1525 = vst.msk [vmem:[#allocation5 + $0x1a] sm:$0x1] %vm1511_vm1, %v692_v0  ;;  %v860_v61 = vcombine.high %v858_v48, %v858_v48  ;;  %v874_v62 = vrot.slane %v858_v48, %v2078_v54  ;;  %v990_v3 = vcombine.high %v986_v57, %v986_v57 }
 0x123   :  { %1526 = vst.msk [vmem:[#allocation5 + $0x1c] sm:$0x1] %vm1511_vm1, %v694_v1  ;;  %1651 = vst.msk [vmem:[#allocation5 + $0x17] sm:$0x1] %vm1511_vm1, %v695_v2  ;;  %v2277_v2 = vpop.f32.mrb[14].mxu1  ;;  %v1105_v5 = vcombine.high %v1103_v55, %v1103_v55 }
 0x124   :  { %1653 = vst.msk [vmem:[#allocation5 + $0x1b] sm:$0x1] %vm1511_vm1, %v692_v0  ;;  %1654 = vst.msk [vmem:[#allocation5 + $0x1d] sm:$0x1] %vm1511_vm1, %v694_v1  ;;  %v881_v0 = vrot.slane %v859_v49, %v2078_v54  ;;  %v889_v1 = vcombine.high %v867_v50, %v867_v50  ;;  %v890_v11 = vcombine.high %v874_v62, %v874_v62 }
 0x125   :  { %1561 = vst.msk [vmem:[#allocation5 + $0x62] sm:$0x1] %vm1511_vm1, %v930_v7  ;;  %1562 = vst.msk [vmem:[#allocation5 + $0x64] sm:$0x1] %vm1511_vm1, %v938_v8  ;;  %v1133_v14 = vrot.slane %v1105_v5, %v2078_v54 }
 0x126   :  { %1564 = vst.msk [vmem:[#allocation5 + $0x68] sm:$0x1] %vm1511_vm1, %v923_v6  ;;  %1689 = vst.msk [vmem:[#allocation5 + $0x63] sm:$0x1] %vm1511_vm1, %v930_v7  ;;  %v1119_v7 = vrot.slane %v1103_v55, %v2078_v54  ;;  %v891_v12 = vcombine.high %v881_v0, %v881_v0 }
 0x127   :  { %1690 = vst.msk [vmem:[#allocation5 + $0x65] sm:$0x1] %vm1511_vm1, %v938_v8  ;;  %1692 = vst.msk [vmem:[#allocation5 + $0x69] sm:$0x1] %vm1511_vm1, %v923_v6  ;;  %v1112_v6 = vrot.slane %v1096_v42, %v2078_v54  ;;  %v2287_v8 = vpop.f32.mrb[15].mxu1 }
 0x128   :  { %1527 = vst.msk [vmem:[#allocation5 + $0x1e] sm:$0x1] %vm1511_vm1, %v696_v10  ;;  %1655 = vst.msk [vmem:[#allocation5 + $0x1f] sm:$0x1] %vm1511_vm1, %v696_v10  ;;  %v888_v10 = vrot.slane %v860_v61, %v2078_v54 }
 0x129   :  { %1544 = vst.msk [vmem:[#allocation5 + $0x40] sm:$0x1] %vm1511_vm1, %v818_v13  ;;  %1672 = vst.msk [vmem:[#allocation5 + $0x41] sm:$0x1] %vm1511_vm1, %v818_v13  ;;  %v1126_v13 = vrot.slane %v1104_v51, %v2078_v54 }
 0x12a   :  { %1563 = vst.msk [vmem:[#allocation5 + $0x66] sm:$0x1] %vm1511_vm1, %v940_v17  ;;  %1565 = vst.msk [vmem:[#allocation5 + $0x6a] sm:$0x1] %vm1511_vm1, %v937_v15  ;;  %v892_v18 = vcombine.high %v888_v10, %v888_v10 }
 0x12b   :  { %1566 = vst.msk [vmem:[#allocation5 + $0x6c] sm:$0x1] %vm1511_vm1, %v939_v16  ;;  %1691 = vst.msk [vmem:[#allocation5 + $0x67] sm:$0x1] %vm1511_vm1, %v940_v17  ;;  %v1902_v17 = vadd.f32 %v2169_v63, %v2204_v19  ;;  %v1136_v20 = vcombine.high %v1126_v13, %v1126_v13  ;;  %v1903_v63 = vadd.f32 %v2179_v4, %v2212_v24 }
 0x12c   :  { %1693 = vst.msk [vmem:[#allocation5 + $0x6b] sm:$0x1] %vm1511_vm1, %v937_v15  ;;  %1694 = vst.msk [vmem:[#allocation5 + $0x6d] sm:$0x1] %vm1511_vm1, %v939_v16  ;;  %v1134_v15 = vcombine.high %v1112_v6, %v1112_v6  ;;  %v1135_v16 = vcombine.high %v1119_v7, %v1119_v7  ;;  %v1904_v19 = vadd.f32 %v2185_v9, %v2223_v28 }
 0x12d   :  { %1545 = vst.msk [vmem:[#allocation5 + $0x42] sm:$0x1] %vm1511_vm1, %v832_v22  ;;  %1546 = vst.msk [vmem:[#allocation5 + $0x44] sm:$0x1] %vm1511_vm1, %v840_v23  ;;  %v2327_v4 = vadd.f32 %v2233_v32, %v2262_v56  ;;  %v1138_v9 = vcombine.high %v1903_v63, %v1903_v63  ;;  %v1145_v24 = vrot.slane %v1903_v63, %v2078_v54 }
 0x12e   :  { %1548 = vst.msk [vmem:[#allocation5 + $0x48] sm:$0x1] %vm1511_vm1, %v825_v21  ;;  %1673 = vst.msk [vmem:[#allocation5 + $0x43] sm:$0x1] %vm1511_vm1, %v832_v22  ;;  %v991_v22 = vcombine.high %v1902_v17, %v1902_v17  ;;  %v1047_v52 = vrot.slane %v1904_v19, %v2078_v54 }
 0x12f   :  { %1674 = vst.msk [vmem:[#allocation5 + $0x45] sm:$0x1] %vm1511_vm1, %v840_v23  ;;  %1676 = vst.msk [vmem:[#allocation5 + $0x49] sm:$0x1] %vm1511_vm1, %v825_v21  ;;  %v1137_v21 = vcombine.high %v1133_v14, %v1133_v14  ;;  %v998_v23 = vrot.slane %v1902_v17, %v2078_v54  ;;  %v1161_v53 = vrot.slane %v1145_v24, %v2078_v54 }
 0x130   :  { %1567 = vst.msk [vmem:[#allocation5 + $0x6e] sm:$0x1] %vm1511_vm1, %v941_v25  ;;  %1695 = vst.msk [vmem:[#allocation5 + $0x6f] sm:$0x1] %vm1511_vm1, %v941_v25  ;;  %v1040_v25 = vcombine.high %v1904_v19, %v1904_v19  ;;  %v1005_v26 = vrot.slane %v991_v22, %v2078_v54 }
 0x131   :  { %1547 = vst.msk [vmem:[#allocation5 + $0x46] sm:$0x1] %vm1511_vm1, %v842_v31  ;;  %1549 = vst.msk [vmem:[#allocation5 + $0x4a] sm:$0x1] %vm1511_vm1, %v839_v29  ;;  %v1006_v27 = vcombine.high %v998_v23, %v998_v23  ;;  %v1014_v28 = vrot.slane %v998_v23, %v2078_v54  ;;  %v1183_v42 = vcombine.high %v1161_v53, %v1161_v53 }
 0x132   :  { %1550 = vst.msk [vmem:[#allocation5 + $0x4c] sm:$0x1] %vm1511_vm1, %v841_v30  ;;  %1675 = vst.msk [vmem:[#allocation5 + $0x47] sm:$0x1] %vm1511_vm1, %v842_v31  ;;  %v1153_v31 = vcombine.high %v1145_v24, %v1145_v24  ;;  %v1054_v32 = vrot.slane %v1040_v25, %v2078_v54  ;;  %v1007_v33 = vcombine.high %v1005_v26, %v1005_v26 }
 0x133   :  { %1677 = vst.msk [vmem:[#allocation5 + $0x4b] sm:$0x1] %vm1511_vm1, %v839_v29  ;;  %1678 = vst.msk [vmem:[#allocation5 + $0x4d] sm:$0x1] %vm1511_vm1, %v841_v30  ;;  %v1285_v29 = vcombine.high %v2327_v4, %v2327_v4  ;;  %v1152_v30 = vrot.slane %v1138_v9, %v2078_v54  ;;  %v1021_v34 = vrot.slane %v1005_v26, %v2078_v54 }
 0x134   :  { %1568 = vst.msk [vmem:[#allocation5 + $0x70] sm:$0x1] %vm1511_vm1, %v965_v35  ;;  %1696 = vst.msk [vmem:[#allocation5 + $0x71] sm:$0x1] %vm1511_vm1, %v965_v35  ;;  %v1028_v35 = vrot.slane %v1006_v27, %v2078_v54  ;;  %v1036_v36 = vcombine.high %v1014_v28, %v1014_v28  ;;  %v1175_v41 = vrot.slane %v1153_v31, %v2078_v54 }
 0x135   :  { %1551 = vst.msk [vmem:[#allocation5 + $0x4e] sm:$0x1] %vm1511_vm1, %v843_v39  ;;  %1679 = vst.msk [vmem:[#allocation5 + $0x4f] sm:$0x1] %vm1511_vm1, %v843_v39  ;;  %v1154_v39 = vcombine.high %v1152_v30, %v1152_v30  ;;  %v1168_v40 = vrot.slane %v1152_v30, %v2078_v54  ;;  %v1035_v43 = vrot.slane %v1007_v33, %v2078_v54 }
 0x136   :  { %1569 = vst.msk [vmem:[#allocation5 + $0x72] sm:$0x1] %vm1511_vm1, %v979_v45  ;;  %1570 = vst.msk [vmem:[#allocation5 + $0x74] sm:$0x1] %vm1511_vm1, %v987_v46  ;;  %v1056_v55 = vcombine.high %v1054_v32, %v1054_v32 }
 0x137   :  { %1572 = vst.msk [vmem:[#allocation5 + $0x78] sm:$0x1] %vm1511_vm1, %v972_v44  ;;  %1697 = vst.msk [vmem:[#allocation5 + $0x73] sm:$0x1] %vm1511_vm1, %v979_v45  ;;  %v1038_v45 = vcombine.high %v1028_v35, %v1028_v35  ;;  %v1182_v48 = vrot.slane %v1154_v39, %v2078_v54  ;;  %v1184_v49 = vcombine.high %v1168_v40, %v1168_v40 }
 0x138   :  { %1698 = vst.msk [vmem:[#allocation5 + $0x75] sm:$0x1] %vm1511_vm1, %v987_v46  ;;  %1700 = vst.msk [vmem:[#allocation5 + $0x79] sm:$0x1] %vm1511_vm1, %v972_v44  ;;  %v1037_v44 = vcombine.high %v1021_v34, %v1021_v34  ;;  %v1055_v46 = vcombine.high %v1047_v52, %v1047_v52  ;;  %v1039_v56 = vcombine.high %v1035_v43, %v1035_v43 }
 0x139   :  { %1552 = vst.msk [vmem:[#allocation5 + $0x50] sm:$0x1] %vm1511_vm1, %v867_v50  ;;  %1680 = vst.msk [vmem:[#allocation5 + $0x51] sm:$0x1] %vm1511_vm1, %v867_v50  ;;  %v1185_v50 = vcombine.high %v1175_v41, %v1175_v41  ;;  %v1186_v51 = vcombine.high %v1182_v48, %v1182_v48  ;;  %v1084_v61 = vrot.slane %v1056_v55, %v2078_v54 }
 0x13a   :  { %1571 = vst.msk [vmem:[#allocation5 + $0x76] sm:$0x1] %vm1511_vm1, %v989_v59  ;;  %1573 = vst.msk [vmem:[#allocation5 + $0x7a] sm:$0x1] %vm1511_vm1, %v986_v57 }
 0x13b   :  { %1574 = vst.msk [vmem:[#allocation5 + $0x7c] sm:$0x1] %vm1511_vm1, %v988_v58  ;;  %1699 = vst.msk [vmem:[#allocation5 + $0x77] sm:$0x1] %vm1511_vm1, %v989_v59  ;;  %v1077_v59 = vrot.slane %v1055_v46, %v2078_v54 }
 0x13c   :  { %1701 = vst.msk [vmem:[#allocation5 + $0x7b] sm:$0x1] %vm1511_vm1, %v986_v57  ;;  %1702 = vst.msk [vmem:[#allocation5 + $0x7d] sm:$0x1] %vm1511_vm1, %v988_v58  ;;  %v1063_v57 = vrot.slane %v1047_v52, %v2078_v54  ;;  %v1070_v58 = vrot.slane %v1054_v32, %v2078_v54 }
 0x13d   :  { %1553 = vst.msk [vmem:[#allocation5 + $0x52] sm:$0x1] %vm1511_vm1, %v881_v0  ;;  %1554 = vst.msk [vmem:[#allocation5 + $0x54] sm:$0x1] %vm1511_vm1, %v889_v1  ;;  %v1087_v5 = vcombine.high %v1077_v59, %v1077_v59 }
 0x13e   :  { %1556 = vst.msk [vmem:[#allocation5 + $0x58] sm:$0x1] %vm1511_vm1, %v874_v62  ;;  %1681 = vst.msk [vmem:[#allocation5 + $0x53] sm:$0x1] %vm1511_vm1, %v881_v0  ;;  %v1299_v0 = vrot.slane %v1285_v29, %v2078_v54 }
 0x13f   :  { %1682 = vst.msk [vmem:[#allocation5 + $0x55] sm:$0x1] %vm1511_vm1, %v889_v1  ;;  %1684 = vst.msk [vmem:[#allocation5 + $0x59] sm:$0x1] %vm1511_vm1, %v874_v62  ;;  %v1292_v62 = vrot.slane %v2327_v4, %v2078_v54  ;;  %v1085_v1 = vcombine.high %v1063_v57, %v1063_v57 }
 0x140   :  { %1575 = vst.msk [vmem:[#allocation5 + $0x7e] sm:$0x1] %vm1511_vm1, %v990_v3  ;;  %1703 = vst.msk [vmem:[#allocation5 + $0x7f] sm:$0x1] %vm1511_vm1, %v990_v3  ;;  %v1086_v3 = vcombine.high %v1070_v58, %v1070_v58 }
 0x141   :  { %1592 = vst.msk [vmem:[#allocation5 + $0xa0] sm:$0x1] %vm1511_vm1, %v1112_v6  ;;  %1596 = vst.msk [vmem:[#allocation5 + $0xa8] sm:$0x1] %vm1511_vm1, %v1119_v7 }
 0x142   :  { %1720 = vst.msk [vmem:[#allocation5 + $0xa1] sm:$0x1] %vm1511_vm1, %v1112_v6  ;;  %1724 = vst.msk [vmem:[#allocation5 + $0xa9] sm:$0x1] %vm1511_vm1, %v1119_v7  ;;  %v1906_v6 = vadd.f32 %v2239_v38, %v2271_v60  ;;  %v1088_v7 = vcombine.high %v1084_v61, %v1084_v61  ;;  %v1315_v38 = vrot.slane %v1299_v0, %v2078_v54 }
 0x143   :  { %1555 = vst.msk [vmem:[#allocation5 + $0x56] sm:$0x1] %vm1511_vm1, %v891_v12  ;;  %1557 = vst.msk [vmem:[#allocation5 + $0x5a] sm:$0x1] %vm1511_vm1, %v888_v10 }
 0x144   :  { %1558 = vst.msk [vmem:[#allocation5 + $0x5c] sm:$0x1] %vm1511_vm1, %v890_v11  ;;  %1683 = vst.msk [vmem:[#allocation5 + $0x57] sm:$0x1] %vm1511_vm1, %v891_v12  ;;  %v1308_v12 = vrot.slane %v1292_v62, %v2078_v54  ;;  %v1187_v60 = vcombine.high %v1906_v6, %v1906_v6 }
 0x145   :  { %1685 = vst.msk [vmem:[#allocation5 + $0x5b] sm:$0x1] %vm1511_vm1, %v888_v10  ;;  %1686 = vst.msk [vmem:[#allocation5 + $0x5d] sm:$0x1] %vm1511_vm1, %v890_v11  ;;  %v1300_v10 = vcombine.high %v1292_v62, %v1292_v62  ;;  %v1301_v11 = vcombine.high %v1299_v0, %v1299_v0 }
 0x146   :  { %1593 = vst.msk [vmem:[#allocation5 + $0xa2] sm:$0x1] %vm1511_vm1, %v1126_v13  ;;  %1721 = vst.msk [vmem:[#allocation5 + $0xa3] sm:$0x1] %vm1511_vm1, %v1126_v13  ;;  %v1194_v13 = vrot.slane %v1906_v6, %v2078_v54  ;;  %v1330_v17 = vcombine.high %v1308_v12, %v1308_v12 }
 0x147   :  { %1594 = vst.msk [vmem:[#allocation5 + $0xa4] sm:$0x1] %vm1511_vm1, %v1134_v15  ;;  %1597 = vst.msk [vmem:[#allocation5 + $0xaa] sm:$0x1] %vm1511_vm1, %v1133_v14 }
 0x148   :  { %1598 = vst.msk [vmem:[#allocation5 + $0xac] sm:$0x1] %vm1511_vm1, %v1135_v16  ;;  %1722 = vst.msk [vmem:[#allocation5 + $0xa5] sm:$0x1] %vm1511_vm1, %v1134_v15  ;;  %v1322_v15 = vrot.slane %v1300_v10, %v2078_v54  ;;  %v1210_v63 = vrot.slane %v1194_v13, %v2078_v54 }
 0x149   :  { %1725 = vst.msk [vmem:[#allocation5 + $0xab] sm:$0x1] %vm1511_vm1, %v1133_v14  ;;  %1726 = vst.msk [vmem:[#allocation5 + $0xad] sm:$0x1] %vm1511_vm1, %v1135_v16  ;;  %v1907_v14 = vadd.f32 %v2249_v37, %v2277_v2  ;;  %v1329_v16 = vrot.slane %v1301_v11, %v2078_v54  ;;  %v1201_v37 = vrot.slane %v1187_v60, %v2078_v54 }
 0x14a   :  { %1559 = vst.msk [vmem:[#allocation5 + $0x5e] sm:$0x1] %vm1511_vm1, %v892_v18  ;;  %1687 = vst.msk [vmem:[#allocation5 + $0x5f] sm:$0x1] %vm1511_vm1, %v892_v18  ;;  %v1908_v18 = vadd.f32 %v2255_v47, %v2287_v8  ;;  %v1202_v2 = vcombine.high %v1194_v13, %v1194_v13  ;;  %v1332_v19 = vcombine.high %v1322_v15, %v1322_v15 }
 0x14b   :  { %1595 = vst.msk [vmem:[#allocation5 + $0xa6] sm:$0x1] %vm1511_vm1, %v1136_v20  ;;  %1723 = vst.msk [vmem:[#allocation5 + $0xa7] sm:$0x1] %vm1511_vm1, %v1136_v20  ;;  %v1331_v20 = vcombine.high %v1315_v38, %v1315_v38  ;;  %v1334_v47 = vcombine.high %v1907_v14, %v1907_v14  ;;  %v1341_v8 = vrot.slane %v1907_v14, %v2078_v54 }
 0x14c   :  { %1599 = vst.msk [vmem:[#allocation5 + $0xae] sm:$0x1] %vm1511_vm1, %v1137_v21  ;;  %1727 = vst.msk [vmem:[#allocation5 + $0xaf] sm:$0x1] %vm1511_vm1, %v1137_v21  ;;  %v1333_v21 = vcombine.high %v1329_v16, %v1329_v16  ;;  %v1203_v22 = vcombine.high %v1201_v37, %v1201_v37  ;;  %v1217_v23 = vrot.slane %v1201_v37, %v2078_v54 }
 0x14d   :  { %1576 = vst.msk [vmem:[#allocation5 + $0x80] sm:$0x1] %vm1511_vm1, %v1014_v28  ;;  %1704 = vst.msk [vmem:[#allocation5 + $0x81] sm:$0x1] %vm1511_vm1, %v1014_v28  ;;  %v1224_v4 = vrot.slane %v1202_v2, %v2078_v54  ;;  %v1232_v9 = vcombine.high %v1210_v63, %v1210_v63  ;;  %v1348_v24 = vrot.slane %v1334_v47, %v2078_v54 }
 0x14e   :  { %1600 = vst.msk [vmem:[#allocation5 + $0xb0] sm:$0x1] %vm1511_vm1, %v1161_v53  ;;  %1728 = vst.msk [vmem:[#allocation5 + $0xb1] sm:$0x1] %vm1511_vm1, %v1161_v53  ;;  %v1349_v25 = vcombine.high %v1341_v8, %v1341_v8  ;;  %v1357_v52 = vrot.slane %v1341_v8, %v2078_v54  ;;  %v1236_v26 = vcombine.high %v1908_v18, %v1908_v18 }
 0x14f   :  { %1577 = vst.msk [vmem:[#allocation5 + $0x82] sm:$0x1] %vm1511_vm1, %v1028_v35  ;;  %1578 = vst.msk [vmem:[#allocation5 + $0x84] sm:$0x1] %vm1511_vm1, %v1036_v36  ;;  %v1231_v27 = vrot.slane %v1203_v22, %v2078_v54  ;;  %v1233_v28 = vcombine.high %v1217_v23, %v1217_v23  ;;  %v1234_v29 = vcombine.high %v1224_v4, %v1224_v4 }
 0x150   :  { %1580 = vst.msk [vmem:[#allocation5 + $0x88] sm:$0x1] %vm1511_vm1, %v1021_v34  ;;  %1705 = vst.msk [vmem:[#allocation5 + $0x83] sm:$0x1] %vm1511_vm1, %v1028_v35  ;;  %v1243_v30 = vrot.slane %v1908_v18, %v2078_v54  ;;  %v1350_v31 = vcombine.high %v1348_v24, %v1348_v24  ;;  %v1364_v53 = vrot.slane %v1348_v24, %v2078_v54 }
 0x151   :  { %1706 = vst.msk [vmem:[#allocation5 + $0x85] sm:$0x1] %vm1511_vm1, %v1036_v36  ;;  %1708 = vst.msk [vmem:[#allocation5 + $0x89] sm:$0x1] %vm1511_vm1, %v1021_v34  ;;  %v1371_v32 = vrot.slane %v1349_v25, %v2078_v54  ;;  %v1379_v33 = vcombine.high %v1357_v52, %v1357_v52  ;;  %v1235_v34 = vcombine.high %v1231_v27, %v1231_v27 }
 0x152   :  { %1601 = vst.msk [vmem:[#allocation5 + $0xb2] sm:$0x1] %vm1511_vm1, %v1175_v41  ;;  %1602 = vst.msk [vmem:[#allocation5 + $0xb4] sm:$0x1] %vm1511_vm1, %v1183_v42  ;;  %v1250_v35 = vrot.slane %v1236_v26, %v2078_v54  ;;  %v1251_v36 = vcombine.high %v1243_v30, %v1243_v30  ;;  %v1259_v39 = vrot.slane %v1243_v30, %v2078_v54 }
 0x153   :  { %1604 = vst.msk [vmem:[#allocation5 + $0xb8] sm:$0x1] %vm1511_vm1, %v1168_v40  ;;  %1729 = vst.msk [vmem:[#allocation5 + $0xb3] sm:$0x1] %vm1511_vm1, %v1175_v41  ;;  %v1380_v41 = vcombine.high %v1364_v53, %v1364_v53 }
 0x154   :  { %1730 = vst.msk [vmem:[#allocation5 + $0xb5] sm:$0x1] %vm1511_vm1, %v1183_v42  ;;  %1732 = vst.msk [vmem:[#allocation5 + $0xb9] sm:$0x1] %vm1511_vm1, %v1168_v40  ;;  %v1378_v40 = vrot.slane %v1350_v31, %v2078_v54  ;;  %v1381_v42 = vcombine.high %v1371_v32, %v1371_v32  ;;  %v1281_v46 = vcombine.high %v1259_v39, %v1259_v39 }
 0x155   :  { %1579 = vst.msk [vmem:[#allocation5 + $0x86] sm:$0x1] %vm1511_vm1, %v1038_v45  ;;  %1581 = vst.msk [vmem:[#allocation5 + $0x8a] sm:$0x1] %vm1511_vm1, %v1035_v43 }
 0x156   :  { %1582 = vst.msk [vmem:[#allocation5 + $0x8c] sm:$0x1] %vm1511_vm1, %v1037_v44  ;;  %1707 = vst.msk [vmem:[#allocation5 + $0x87] sm:$0x1] %vm1511_vm1, %v1038_v45  ;;  %v1273_v45 = vrot.slane %v1251_v36, %v2078_v54 }
 0x157   :  { %1709 = vst.msk [vmem:[#allocation5 + $0x8b] sm:$0x1] %vm1511_vm1, %v1035_v43  ;;  %1710 = vst.msk [vmem:[#allocation5 + $0x8d] sm:$0x1] %vm1511_vm1, %v1037_v44  ;;  %v1252_v43 = vcombine.high %v1250_v35, %v1250_v35  ;;  %v1266_v44 = vrot.slane %v1250_v35, %v2078_v54 }
 0x158   :  { %1603 = vst.msk [vmem:[#allocation5 + $0xb6] sm:$0x1] %vm1511_vm1, %v1185_v50  ;;  %1605 = vst.msk [vmem:[#allocation5 + $0xba] sm:$0x1] %vm1511_vm1, %v1182_v48  ;;  %v1283_v55 = vcombine.high %v1273_v45, %v1273_v45 }
 0x159   :  { %1606 = vst.msk [vmem:[#allocation5 + $0xbc] sm:$0x1] %vm1511_vm1, %v1184_v49  ;;  %1731 = vst.msk [vmem:[#allocation5 + $0xb7] sm:$0x1] %vm1511_vm1, %v1185_v50  ;;  %v1282_v50 = vcombine.high %v1266_v44, %v1266_v44 }
 0x15a   :  { %1733 = vst.msk [vmem:[#allocation5 + $0xbb] sm:$0x1] %vm1511_vm1, %v1182_v48  ;;  %1734 = vst.msk [vmem:[#allocation5 + $0xbd] sm:$0x1] %vm1511_vm1, %v1184_v49  ;;  %v1382_v48 = vcombine.high %v1378_v40, %v1378_v40  ;;  %v1280_v49 = vrot.slane %v1252_v43, %v2078_v54 }
 0x15b   :  { %1583 = vst.msk [vmem:[#allocation5 + $0x8e] sm:$0x1] %vm1511_vm1, %v1039_v56  ;;  %1711 = vst.msk [vmem:[#allocation5 + $0x8f] sm:$0x1] %vm1511_vm1, %v1039_v56 }
 0x15c   :  { %1584 = vst.msk [vmem:[#allocation5 + $0x90] sm:$0x1] %vm1511_vm1, %v1063_v57  ;;  %1585 = vst.msk [vmem:[#allocation5 + $0x92] sm:$0x1] %vm1511_vm1, %v1077_v59  ;;  %v1284_v54 = vcombine.high %v1280_v49, %v1280_v49 }
 0x15d   :  { %1588 = vst.msk [vmem:[#allocation5 + $0x98] sm:$0x1] %vm1511_vm1, %v1070_v58  ;;  %1712 = vst.msk [vmem:[#allocation5 + $0x91] sm:$0x1] %vm1511_vm1, %v1063_v57 }
 0x15e   :  { %1713 = vst.msk [vmem:[#allocation5 + $0x93] sm:$0x1] %vm1511_vm1, %v1077_v59  ;;  %1716 = vst.msk [vmem:[#allocation5 + $0x99] sm:$0x1] %vm1511_vm1, %v1070_v58 }
 0x15f   :  { %1607 = vst.msk [vmem:[#allocation5 + $0xbe] sm:$0x1] %vm1511_vm1, %v1186_v51  ;;  %1735 = vst.msk [vmem:[#allocation5 + $0xbf] sm:$0x1] %vm1511_vm1, %v1186_v51 }
 0x160   :  { %1589 = vst.msk [vmem:[#allocation5 + $0x9a] sm:$0x1] %vm1511_vm1, %v1084_v61  ;;  %1717 = vst.msk [vmem:[#allocation5 + $0x9b] sm:$0x1] %vm1511_vm1, %v1084_v61 }
 0x161   :  { %1586 = vst.msk [vmem:[#allocation5 + $0x94] sm:$0x1] %vm1511_vm1, %v1085_v1  ;;  %1587 = vst.msk [vmem:[#allocation5 + $0x96] sm:$0x1] %vm1511_vm1, %v1087_v5 }
 0x162   :  { %1590 = vst.msk [vmem:[#allocation5 + $0x9c] sm:$0x1] %vm1511_vm1, %v1086_v3  ;;  %1714 = vst.msk [vmem:[#allocation5 + $0x95] sm:$0x1] %vm1511_vm1, %v1085_v1 }
 0x163   :  { %1715 = vst.msk [vmem:[#allocation5 + $0x97] sm:$0x1] %vm1511_vm1, %v1087_v5  ;;  %1718 = vst.msk [vmem:[#allocation5 + $0x9d] sm:$0x1] %vm1511_vm1, %v1086_v3 }
 0x164   :  { %1591 = vst.msk [vmem:[#allocation5 + $0x9e] sm:$0x1] %vm1511_vm1, %v1088_v7  ;;  %1719 = vst.msk [vmem:[#allocation5 + $0x9f] sm:$0x1] %vm1511_vm1, %v1088_v7 }
 0x165   :  { %1624 = vst.msk [vmem:[#allocation5 + $0xe0] sm:$0x1] %vm1511_vm1, %v1308_v12  ;;  %1752 = vst.msk [vmem:[#allocation5 + $0xe1] sm:$0x1] %vm1511_vm1, %v1308_v12 }
 0x166   :  { %1628 = vst.msk [vmem:[#allocation5 + $0xe8] sm:$0x1] %vm1511_vm1, %v1315_v38  ;;  %1756 = vst.msk [vmem:[#allocation5 + $0xe9] sm:$0x1] %vm1511_vm1, %v1315_v38 }
 0x167   :  { %1625 = vst.msk [vmem:[#allocation5 + $0xe2] sm:$0x1] %vm1511_vm1, %v1322_v15  ;;  %1626 = vst.msk [vmem:[#allocation5 + $0xe4] sm:$0x1] %vm1511_vm1, %v1330_v17 }
 0x168   :  { %1629 = vst.msk [vmem:[#allocation5 + $0xea] sm:$0x1] %vm1511_vm1, %v1329_v16  ;;  %1753 = vst.msk [vmem:[#allocation5 + $0xe3] sm:$0x1] %vm1511_vm1, %v1322_v15 }
 0x169   :  { %1754 = vst.msk [vmem:[#allocation5 + $0xe5] sm:$0x1] %vm1511_vm1, %v1330_v17  ;;  %1757 = vst.msk [vmem:[#allocation5 + $0xeb] sm:$0x1] %vm1511_vm1, %v1329_v16 }
 0x16a   :  { %1630 = vst.msk [vmem:[#allocation5 + $0xec] sm:$0x1] %vm1511_vm1, %v1331_v20  ;;  %1758 = vst.msk [vmem:[#allocation5 + $0xed] sm:$0x1] %vm1511_vm1, %v1331_v20 }
 0x16b   :  { %1608 = vst.msk [vmem:[#allocation5 + $0xc0] sm:$0x1] %vm1511_vm1, %v1210_v63  ;;  %1736 = vst.msk [vmem:[#allocation5 + $0xc1] sm:$0x1] %vm1511_vm1, %v1210_v63 }
 0x16c   :  { %1627 = vst.msk [vmem:[#allocation5 + $0xe6] sm:$0x1] %vm1511_vm1, %v1332_v19  ;;  %1631 = vst.msk [vmem:[#allocation5 + $0xee] sm:$0x1] %vm1511_vm1, %v1333_v21 }
 0x16d   :  { %1755 = vst.msk [vmem:[#allocation5 + $0xe7] sm:$0x1] %vm1511_vm1, %v1332_v19  ;;  %1759 = vst.msk [vmem:[#allocation5 + $0xef] sm:$0x1] %vm1511_vm1, %v1333_v21 }
 0x16e   :  { %1609 = vst.msk [vmem:[#allocation5 + $0xc2] sm:$0x1] %vm1511_vm1, %v1224_v4  ;;  %1610 = vst.msk [vmem:[#allocation5 + $0xc4] sm:$0x1] %vm1511_vm1, %v1232_v9 }
 0x16f   :  { %1612 = vst.msk [vmem:[#allocation5 + $0xc8] sm:$0x1] %vm1511_vm1, %v1217_v23  ;;  %1737 = vst.msk [vmem:[#allocation5 + $0xc3] sm:$0x1] %vm1511_vm1, %v1224_v4 }
 0x170   :  { %1738 = vst.msk [vmem:[#allocation5 + $0xc5] sm:$0x1] %vm1511_vm1, %v1232_v9  ;;  %1740 = vst.msk [vmem:[#allocation5 + $0xc9] sm:$0x1] %vm1511_vm1, %v1217_v23 }
 0x171   :  { %1632 = vst.msk [vmem:[#allocation5 + $0xf0] sm:$0x1] %vm1511_vm1, %v1357_v52  ;;  %1760 = vst.msk [vmem:[#allocation5 + $0xf1] sm:$0x1] %vm1511_vm1, %v1357_v52 }
 0x172   :  { %1611 = vst.msk [vmem:[#allocation5 + $0xc6] sm:$0x1] %vm1511_vm1, %v1234_v29  ;;  %1613 = vst.msk [vmem:[#allocation5 + $0xca] sm:$0x1] %vm1511_vm1, %v1231_v27 }
 0x173   :  { %1614 = vst.msk [vmem:[#allocation5 + $0xcc] sm:$0x1] %vm1511_vm1, %v1233_v28  ;;  %1739 = vst.msk [vmem:[#allocation5 + $0xc7] sm:$0x1] %vm1511_vm1, %v1234_v29 }
 0x174   :  { %1741 = vst.msk [vmem:[#allocation5 + $0xcb] sm:$0x1] %vm1511_vm1, %v1231_v27  ;;  %1742 = vst.msk [vmem:[#allocation5 + $0xcd] sm:$0x1] %vm1511_vm1, %v1233_v28 }
 0x175   :  { %1633 = vst.msk [vmem:[#allocation5 + $0xf2] sm:$0x1] %vm1511_vm1, %v1371_v32  ;;  %1634 = vst.msk [vmem:[#allocation5 + $0xf4] sm:$0x1] %vm1511_vm1, %v1379_v33 }
 0x176   :  { %1636 = vst.msk [vmem:[#allocation5 + $0xf8] sm:$0x1] %vm1511_vm1, %v1364_v53  ;;  %1761 = vst.msk [vmem:[#allocation5 + $0xf3] sm:$0x1] %vm1511_vm1, %v1371_v32 }
 0x177   :  { %1762 = vst.msk [vmem:[#allocation5 + $0xf5] sm:$0x1] %vm1511_vm1, %v1379_v33  ;;  %1764 = vst.msk [vmem:[#allocation5 + $0xf9] sm:$0x1] %vm1511_vm1, %v1364_v53 }
 0x178   :  { %1615 = vst.msk [vmem:[#allocation5 + $0xce] sm:$0x1] %vm1511_vm1, %v1235_v34  ;;  %1743 = vst.msk [vmem:[#allocation5 + $0xcf] sm:$0x1] %vm1511_vm1, %v1235_v34 }
 0x179   :  { %1616 = vst.msk [vmem:[#allocation5 + $0xd0] sm:$0x1] %vm1511_vm1, %v1259_v39  ;;  %1744 = vst.msk [vmem:[#allocation5 + $0xd1] sm:$0x1] %vm1511_vm1, %v1259_v39 }
 0x17a   :  { %1635 = vst.msk [vmem:[#allocation5 + $0xf6] sm:$0x1] %vm1511_vm1, %v1381_v42  ;;  %1637 = vst.msk [vmem:[#allocation5 + $0xfa] sm:$0x1] %vm1511_vm1, %v1378_v40 }
 0x17b   :  { %1638 = vst.msk [vmem:[#allocation5 + $0xfc] sm:$0x1] %vm1511_vm1, %v1380_v41  ;;  %1763 = vst.msk [vmem:[#allocation5 + $0xf7] sm:$0x1] %vm1511_vm1, %v1381_v42 }
 0x17c   :  { %1765 = vst.msk [vmem:[#allocation5 + $0xfb] sm:$0x1] %vm1511_vm1, %v1378_v40  ;;  %1766 = vst.msk [vmem:[#allocation5 + $0xfd] sm:$0x1] %vm1511_vm1, %v1380_v41 }
 0x17d   :  { %1617 = vst.msk [vmem:[#allocation5 + $0xd2] sm:$0x1] %vm1511_vm1, %v1273_v45  ;;  %1618 = vst.msk [vmem:[#allocation5 + $0xd4] sm:$0x1] %vm1511_vm1, %v1281_v46 }
 0x17e   :  { %1620 = vst.msk [vmem:[#allocation5 + $0xd8] sm:$0x1] %vm1511_vm1, %v1266_v44  ;;  %1745 = vst.msk [vmem:[#allocation5 + $0xd3] sm:$0x1] %vm1511_vm1, %v1273_v45 }
 0x17f   :  { %1746 = vst.msk [vmem:[#allocation5 + $0xd5] sm:$0x1] %vm1511_vm1, %v1281_v46  ;;  %1748 = vst.msk [vmem:[#allocation5 + $0xd9] sm:$0x1] %vm1511_vm1, %v1266_v44 }
 0x180   :  { %1639 = vst.msk [vmem:[#allocation5 + $0xfe] sm:$0x1] %vm1511_vm1, %v1382_v48  ;;  %1767 = vst.msk [vmem:[#allocation5 + $0xff] sm:$0x1] %vm1511_vm1, %v1382_v48 }
 0x181   :  { %1619 = vst.msk [vmem:[#allocation5 + $0xd6] sm:$0x1] %vm1511_vm1, %v1283_v55  ;;  %1621 = vst.msk [vmem:[#allocation5 + $0xda] sm:$0x1] %vm1511_vm1, %v1280_v49 }
 0x182   :  { %1622 = vst.msk [vmem:[#allocation5 + $0xdc] sm:$0x1] %vm1511_vm1, %v1282_v50  ;;  %1747 = vst.msk [vmem:[#allocation5 + $0xd7] sm:$0x1] %vm1511_vm1, %v1283_v55 }
 0x183   :  { %1749 = vst.msk [vmem:[#allocation5 + $0xdb] sm:$0x1] %vm1511_vm1, %v1280_v49  ;;  %1750 = vst.msk [vmem:[#allocation5 + $0xdd] sm:$0x1] %vm1511_vm1, %v1282_v50 }
 0x184   :  { %1623 = vst.msk [vmem:[#allocation5 + $0xde] sm:$0x1] %vm1511_vm1, %v1284_v54  ;;  %1751 = vst.msk [vmem:[#allocation5 + $0xdf] sm:$0x1] %vm1511_vm1, %v1284_v54 }
 0x185   :  { %1966 = shalt.err (!%p1963_p12)
}
 0x186   :  { %s1967_s28 = scalar_lea.hbm %s2511_s2, 4096 }
 0x187   :  { %p1968_p13 = scmp.ne.s32.totalorder %s2511_s2, %s1967_s28  ;;  %p1971_p0 = scmp.lt.u32.totalorder %s1967_s28, %s2511_s2 }
 0x189   :  { %p1973_p1 = pnand %p1971_p0, %p1968_p13 }
 0x18b   :  { %1976 = shalt.err (!%p1973_p1)
}
 0x18c   :  { %s1986_s5 = smov 32   ;;  %s1987_s6 = smov 2  }
 0x18d   :  { %1779 = dma.vmem_to_hbm [thread:$0]  %s1774_s1, 4096, %s2511_s2, [#allocation4], %s1986_s5, %s1986_s5, %s1987_s6  }
 0x18e   :  { %1979 = dma.done.wait [#allocation4], 4096  }
 0x18f   :  { %1980 = vsyncadd [#allocation4], 4294963200 }
 0x190   :  { %1783 = vsyncpa [#allocation3], 1 }
 0x191   :  { %1784 = vsyncpa [#allocation4], 1 }

</bundles_post_ra>
